<compile_context>
chip_gen: v5e
topology: v5e:2x2
jax: 0.10.0
libtpu: 0.0.40
codegen_flags: <defaults>
</compile_context>

<pallas_src>
import functools

import jax
import jax.numpy as jnp
from jax.experimental import pallas as pl
from jax.experimental.pallas import tpu as pltpu


def _round_up(x: int, m: int) -> int:
    return (x + m - 1) // m * m


def cnn_kernel(x_ref, cw_ref, cb_ref, lw_ref, lb_ref, embT_ref, out_ref, y_scr):
    # x_ref   : (tM, Kp)   bf16  im2col'ed embedded rows for this row tile
    # cw_ref  : (Kp, Hp)   bf16  conv weight, taps stacked along K
    # cb_ref  : (1, Hp)    f32   conv bias
    # lw_ref  : (Hp, Ep)   bf16  linear weight (transposed)
    # lb_ref  : (1, Ep)    f32   linear bias
    # embT_ref: (Ep, tV)   bf16  slice of embedding.weight.T
    # out_ref : (tM, tV)   f32   logits tile
    # y_scr   : (tM, Ep)   f32   Linear output, reused across all vocab tiles
    @pl.when(pl.program_id(1) == 0)
    def _():
        conv = jnp.dot(x_ref[...], cw_ref[...],
                       preferred_element_type=jnp.float32) + cb_ref[...]
        h = jnp.maximum(conv, 0.0).astype(lw_ref.dtype)           # relu -> bf16
        y_scr[...] = jnp.dot(h, lw_ref[...],
                             preferred_element_type=jnp.float32) + lb_ref[...]

    out_ref[...] = jnp.dot(y_scr[...].astype(embT_ref.dtype), embT_ref[...],
                           preferred_element_type=jnp.float32)


@functools.partial(jax.jit, static_argnames=("row_tile", "vocab_tile"))
def cnn_forward(token_ids, emb_w, conv_w, conv_b, lin_w, lin_b,
                *, row_tile=256, vocab_tile=1024):
    """token_ids: (B, S) int32; returns (B, S, V) float32 logits."""
    B, S = token_ids.shape
    V, E = emb_w.shape
    H = conv_w.shape[0]

    # ---- lane / sublane padded sizes and tile sizes -------------------------
    Ep = _round_up(E, 128)
    Hp = _round_up(H, 128)
    Kp = _round_up(3 * E, 128)                       # im2col K (3 conv taps)
    tV = min(vocab_tile, _round_up(V, 128))
    Vp = _round_up(V, tV)
    rows = B * S
    tM = row_tile if rows >= row_tile else _round_up(rows, 8)
    rows_p = _round_up(rows, tM)

    f32, bf16 = jnp.float32, jnp.bfloat16

    # ---- glue (plain JAX): embedding gather, im2col, weight rearrangement ---
    emb = jnp.take(emb_w.astype(f32), token_ids, axis=0)       # (B, S, E)
    # TODO(synk): nn.Dropout is identity at inference; training-mode dropout
    # (pltpu PRNG + mask) is not implemented here.
    emb_z = jnp.pad(emb, ((0, 0), (1, 1), (0, 0)))             # (B, S+2, E)
    # tap k multiplies x[t - 1 + k]  (PyTorch Conv1d, padding=1)
    x_im2col = jnp.concatenate(
        [emb_z[:, 0:S, :], emb_z[:, 1:S + 1, :], emb_z[:, 2:S + 2, :]],
        axis=-1).reshape(rows, 3 * E)                          # (rows, 3E)
    x_rows = jnp.pad(x_im2col,
                     ((0, rows_p - rows), (0, Kp - 3 * E))).astype(bf16)

    # Conv weight (H, E, 3) -> (3, E, H) -> (3E, H), matching im2col ordering.
    cw = jnp.transpose(conv_w, (2, 1, 0)).reshape(3 * E, H)
    conv_w_cat = jnp.pad(cw, ((0, Kp - 3 * E), (0, Hp - H))).astype(bf16)
    conv_b2 = jnp.pad(conv_b, (0, Hp - H)).reshape(1, Hp).astype(f32)

    lin_wT = jnp.pad(lin_w.T, ((0, Hp - H), (0, Ep - E))).astype(bf16)
    lin_b2 = jnp.pad(lin_b, (0, Ep - E)).reshape(1, Ep).astype(f32)

    emb_wT = jnp.pad(emb_w, ((0, Vp - V), (0, Ep - E))).T.astype(bf16)  # (Ep, Vp)

    grid = (rows_p // tM, Vp // tV)

    grid_spec = pltpu.PrefetchScalarGridSpec(
        num_scalar_prefetch=0,
        grid=grid,
        in_specs=[
            pl.BlockSpec((tM, Kp), lambda i, j: (i, 0)),       # row-tile input
            pl.BlockSpec((Kp, Hp), lambda i, j: (0, 0)),       # conv weight
            pl.BlockSpec((1, Hp), lambda i, j: (0, 0)),        # conv bias
            pl.BlockSpec((Hp, Ep), lambda i, j: (0, 0)),       # linear weight
            pl.BlockSpec((1, Ep), lambda i, j: (0, 0)),        # linear bias
            pl.BlockSpec((Ep, tV), lambda i, j: (0, j)),       # embT vocab tile
        ],
        out_specs=pl.BlockSpec((tM, tV), lambda i, j: (i, j)),
        scratch_shapes=[pltpu.VMEM((tM, Ep), jnp.float32)],
    )

    out = pl.pallas_call(
        cnn_kernel,
        out_shape=jax.ShapeDtypeStruct((rows_p, Vp), jnp.float32),
        grid_spec=grid_spec,
        compiler_params=pltpu.CompilerParams(
            dimension_semantics=("parallel", "arbitrary"),
            vmem_limit_bytes=32 * 1024 * 1024),
    )(x_rows, conv_w_cat, conv_b2, lin_wT, lin_b2, emb_wT)

    return out[:rows, :V].reshape(B, S, V)


def cnn_reference(token_ids, emb_w, conv_w, conv_b, lin_w, lin_b):
    """Pure-JAX f32 reference mirroring the PyTorch forward."""
    emb = jnp.take(emb_w, token_ids, axis=0)                   # (B, S, E)
    x = jnp.transpose(emb, (0, 2, 1))                          # (B, E, S)
    conv = jax.lax.conv_general_dilated(
        x, conv_w, window_strides=(1,), padding=((1, 1),),
        dimension_numbers=("NCH", "OIH", "NCH"))
    conv = conv + conv_b[None, :, None]
    h = jax.nn.relu(jnp.transpose(conv, (0, 2, 1)))            # (B, S, H)
    y = jnp.einsum("bsh,eh->bse", h, lin_w) + lin_b
    return jnp.einsum("bse,ve->bsv", y, emb_w)


if __name__ == "__main__":
    # Small shapes consistent with the module.
    vocab_size, embed_dim, hidden_dim = 64, 32, 32
    batch, seq = 2, 8

    key = jax.random.PRNGKey(0)
    k_emb, k_cw, k_cb, k_lw, k_lb, k_x = jax.random.split(key, 6)

    emb_w = jax.random.normal(k_emb, (vocab_size, embed_dim), jnp.float32) * 0.1
    conv_w = jax.random.normal(k_cw, (hidden_dim, embed_dim, 3), jnp.float32) * 0.1
    conv_b = jax.random.normal(k_cb, (hidden_dim,), jnp.float32) * 0.1
    lin_w = jax.random.normal(k_lw, (embed_dim, hidden_dim), jnp.float32) * 0.1
    lin_b = jax.random.normal(k_lb, (embed_dim,), jnp.float32) * 0.1

    token_ids = jax.random.randint(k_x, (batch, seq), 0, vocab_size, jnp.int32)

    probs = cnn_forward(token_ids, emb_w, conv_w, conv_b, lin_w, lin_b)
    probs = jax.block_until_ready(probs)

    ref = cnn_reference(token_ids, emb_w, conv_w, conv_b, lin_w, lin_b)
    assert probs.shape == (batch, seq, vocab_size)
    # bf16 matmul operands (f32 accumulation) -> loosened tolerance vs f32 ref.
    assert jnp.allclose(probs, ref, atol=2e-2, rtol=2e-2)

    print("KERNEL_OK")
</pallas_src>

<mosaic_0001>
module attributes {stable_mosaic.version = 11 : i64} {
  func.func @cnn_kernel(%arg0: i32, %arg1: i32, %arg2: memref<16x128xbf16, #tpu.memory_space<vmem>>, %arg3: memref<128x128xbf16, #tpu.memory_space<vmem>>, %arg4: memref<1x128xf32, #tpu.memory_space<vmem>>, %arg5: memref<128x128xbf16, #tpu.memory_space<vmem>>, %arg6: memref<1x128xf32, #tpu.memory_space<vmem>>, %arg7: memref<128x128xbf16, #tpu.memory_space<vmem>>, %arg8: memref<16x128xf32, #tpu.memory_space<vmem>>, %arg9: memref<16x128xf32, #tpu.memory_space<vmem>>) attributes {dimension_semantics = [#tpu.dimension_semantics<parallel>, #tpu.dimension_semantics<arbitrary>], iteration_bounds = array<i64: 1, 1>, scalar_prefetch = 0 : i64, scratch_operands = 1 : i64, tpu.core_type = #tpu.core_type<tc>, window_params = [{transform_indices = @transform_0, window_bounds = array<i64: 16, 128>}, {pipeline_mode = #tpu.pipeline_mode<synchronous>, transform_indices = @transform_1, window_bounds = array<i64: 128, 128>}, {pipeline_mode = #tpu.pipeline_mode<synchronous>, transform_indices = @transform_2, window_bounds = array<i64: 1, 128>}, {pipeline_mode = #tpu.pipeline_mode<synchronous>, transform_indices = @transform_3, window_bounds = array<i64: 128, 128>}, {pipeline_mode = #tpu.pipeline_mode<synchronous>, transform_indices = @transform_4, window_bounds = array<i64: 1, 128>}, {transform_indices = @transform_5, window_bounds = array<i64: 128, 128>}, {transform_indices = @transform_6, window_bounds = array<i64: 16, 128>}]} {
    %c0_i32 = arith.constant 0 : i32
    %0 = arith.cmpi eq, %arg1, %c0_i32 : i32
    %1 = arith.extui %0 : i1 to i32
    %c0_i32_0 = arith.constant 0 : i32
    %2 = arith.cmpi ne, %1, %c0_i32_0 : i32
    scf.if %2 {
      %c0_6 = arith.constant 0 : index
      %c0_7 = arith.constant 0 : index
      %8 = vector.load %arg2[%c0_6, %c0_7] : memref<16x128xbf16, #tpu.memory_space<vmem>>, vector<16x128xbf16>
      %c0_8 = arith.constant 0 : index
      %c0_9 = arith.constant 0 : index
      %9 = vector.load %arg3[%c0_8, %c0_9] : memref<128x128xbf16, #tpu.memory_space<vmem>>, vector<128x128xbf16>
      %cst_10 = arith.constant dense<0.000000e+00> : vector<16x128xf32>
      %10 = tpu.matmul %8, %9, %cst_10 {dimension_numbers = #tpu.dot_dimension_numbers<[1], [0], [0], [1], [0, 0, 1, 1], [], []>} : vector<16x128xbf16>, vector<128x128xbf16>, vector<16x128xf32> -> vector<16x128xf32>
      %c0_11 = arith.constant 0 : index
      %c0_12 = arith.constant 0 : index
      %11 = vector.load %arg4[%c0_11, %c0_12] : memref<1x128xf32, #tpu.memory_space<vmem>>, vector<1x128xf32>
      %12 = vector.broadcast %11 : vector<1x128xf32> to vector<16x128xf32>
      %13 = arith.addf %10, %12 : vector<16x128xf32>
      %cst_13 = arith.constant 0.000000e+00 : f32
      %14 = vector.broadcast %cst_13 : f32 to vector<16x128xf32>
      %15 = arith.maximumf %13, %14 : vector<16x128xf32>
      %16 = arith.truncf %15 : vector<16x128xf32> to vector<16x128xbf16>
      %c0_14 = arith.constant 0 : index
      %c0_15 = arith.constant 0 : index
      %17 = vector.load %arg5[%c0_14, %c0_15] : memref<128x128xbf16, #tpu.memory_space<vmem>>, vector<128x128xbf16>
      %cst_16 = arith.constant dense<0.000000e+00> : vector<16x128xf32>
      %18 = tpu.matmul %16, %17, %cst_16 {dimension_numbers = #tpu.dot_dimension_numbers<[1], [0], [0], [1], [0, 0, 1, 1], [], []>} : vector<16x128xbf16>, vector<128x128xbf16>, vector<16x128xf32> -> vector<16x128xf32>
      %c0_17 = arith.constant 0 : index
      %c0_18 = arith.constant 0 : index
      %19 = vector.load %arg6[%c0_17, %c0_18] : memref<1x128xf32, #tpu.memory_space<vmem>>, vector<1x128xf32>
      %20 = vector.broadcast %19 : vector<1x128xf32> to vector<16x128xf32>
      %21 = arith.addf %18, %20 : vector<16x128xf32>
      %c0_19 = arith.constant 0 : index
      %c0_20 = arith.constant 0 : index
      %22 = vector.load %arg9[%c0_19, %c0_20] : memref<16x128xf32, #tpu.memory_space<vmem>>, vector<16x128xf32>
      tpu.vector_store %arg9[%c0_19, %c0_20], %21 {strides = array<i32>} : memref<16x128xf32, #tpu.memory_space<vmem>>, vector<16x128xf32>,
    } else {
    }
    %c0 = arith.constant 0 : index
    %c0_1 = arith.constant 0 : index
    %3 = vector.load %arg9[%c0, %c0_1] : memref<16x128xf32, #tpu.memory_space<vmem>>, vector<16x128xf32>
    %4 = arith.truncf %3 : vector<16x128xf32> to vector<16x128xbf16>
    %c0_2 = arith.constant 0 : index
    %c0_3 = arith.constant 0 : index
    %5 = vector.load %arg7[%c0_2, %c0_3] : memref<128x128xbf16, #tpu.memory_space<vmem>>, vector<128x128xbf16>
    %cst = arith.constant dense<0.000000e+00> : vector<16x128xf32>
    %6 = tpu.matmul %4, %5, %cst {dimension_numbers = #tpu.dot_dimension_numbers<[1], [0], [0], [1], [0, 0, 1, 1], [], []>} : vector<16x128xbf16>, vector<128x128xbf16>, vector<16x128xf32> -> vector<16x128xf32>
    %c0_4 = arith.constant 0 : index
    %c0_5 = arith.constant 0 : index
    %7 = vector.load %arg8[%c0_4, %c0_5] : memref<16x128xf32, #tpu.memory_space<vmem>>, vector<16x128xf32>
    tpu.vector_store %arg8[%c0_4, %c0_5], %6 {strides = array<i32>} : memref<16x128xf32, #tpu.memory_space<vmem>>, vector<16x128xf32>,
    return
  }
  func.func @transform_0(%arg0: i32, %arg1: i32) -> (i32, i32) {
    %c0_i32 = arith.constant 0 : i32
    %c0_i32_0 = arith.constant 0 : i32
    return %arg0, %c0_i32 : i32, i32
  }
  func.func @transform_1(%arg0: i32, %arg1: i32) -> (i32, i32) {
    %c0_i32 = arith.constant 0 : i32
    %c0_i32_0 = arith.constant 0 : i32
    %c0_i32_1 = arith.constant 0 : i32
    return %c0_i32, %c0_i32_0 : i32, i32
  }
  func.func @transform_2(%arg0: i32, %arg1: i32) -> (i32, i32) {
    %c0_i32 = arith.constant 0 : i32
    %c0_i32_0 = arith.constant 0 : i32
    %c0_i32_1 = arith.constant 0 : i32
    return %c0_i32, %c0_i32_0 : i32, i32
  }
  func.func @transform_3(%arg0: i32, %arg1: i32) -> (i32, i32) {
    %c0_i32 = arith.constant 0 : i32
    %c0_i32_0 = arith.constant 0 : i32
    %c0_i32_1 = arith.constant 0 : i32
    return %c0_i32, %c0_i32_0 : i32, i32
  }
  func.func @transform_4(%arg0: i32, %arg1: i32) -> (i32, i32) {
    %c0_i32 = arith.constant 0 : i32
    %c0_i32_0 = arith.constant 0 : i32
    %c0_i32_1 = arith.constant 0 : i32
    return %c0_i32, %c0_i32_0 : i32, i32
  }
  func.func @transform_5(%arg0: i32, %arg1: i32) -> (i32, i32) {
    %c0_i32 = arith.constant 0 : i32
    %c0_i32_0 = arith.constant 0 : i32
    return %c0_i32, %arg1 : i32, i32
  }
  func.func @transform_6(%arg0: i32, %arg1: i32) -> (i32, i32) {
    %c0_i32 = arith.constant 0 : i32
    return %arg0, %arg1 : i32, i32
  }
}

</mosaic_0001>

<bundles_post_ra>
// kernel: cnn_forward.1
= control target key start
LH: loop header
LB: loop body
LE: loop exit
PB: predicated region body
PF: predicated region fallthrough
CT: control target
= control target key end

     0   :  { %s540_s1 = inlined_call_operand.vmem [shape: bf16[128,128], index: 1, kind: input, shape index: {}]   ;;  %s541_s3 = inlined_call_operand.vmem [shape: bf16[128,128], index: 3, kind: input, shape index: {}]   ;;  %s542_s2 = inlined_call_operand.vmem [shape: f32[1,128], index: 2, kind: input, shape index: {}]   ;;  %s543_s0 = inlined_call_operand.vmem [shape: bf16[16,128], index: 0, kind: input, shape index: {}]   ;;  %s544_s4 = inlined_call_operand.vmem [shape: f32[1,128], index: 4, kind: input, shape index: {}]   ;;  %s545_s5 = inlined_call_operand.vmem [shape: bf16[128,128], index: 5, kind: input, shape index: {}]   ;;  %s546_s6 = inlined_call_operand.vmem [shape: f32[16,128], index: 6, kind: output, shape index: {}]  }
   0x1   :  { %v399_v0 = vld [vmem:[%s540_s1 + $0x38] sm:$0xff]  ;;  %v398_v1 = vld [vmem:[%s540_s1 + $0x30] sm:$0xff]  ;;  %v397_v4 = vld [vmem:[%s540_s1 + $0x28] sm:$0xff] }
   0x2   :  { %103 = vmatpush.bf16.msra.mxu0 %v399_v0  ;;  %v407_v2 = vld [vmem:[%s541_s3 + $0x38] sm:$0xff]  ;;  %v406_v3 = vld [vmem:[%s541_s3 + $0x30] sm:$0xff]  ;;  %v405_v5 = vld [vmem:[%s541_s3 + $0x28] sm:$0xff] }
   0x3   :  { %188 = vmatpush.bf16.msra.mxu1 %v407_v2  ;;  %v396_v6 = vld [vmem:[%s540_s1 + $0x20] sm:$0xff]  ;;  %v395_v8 = vld [vmem:[%s540_s1 + $0x18] sm:$0xff]  ;;  %v394_v9 = vld [vmem:[%s540_s1 + $0x10] sm:$0xff] }
   0x4   :  { %v404_v7 = vld [vmem:[%s541_s3 + $0x20] sm:$0xff]  ;;  %v393_v10 = vld [vmem:[%s540_s1 + $0x8] sm:$0xff]  ;;  %v403_v13 = vld [vmem:[%s541_s3 + $0x18] sm:$0xff] }
   0x5   :  { %v392_v11 = vld [vmem:[%s540_s1] sm:$0xff]  ;;  %v402_v14 = vld [vmem:[%s541_s3 + $0x10] sm:$0xff]  ;;  %v401_v15 = vld [vmem:[%s541_s3 + $0x8] sm:$0xff] }
   0x6   :  { %104 = vmatpush.bf16.msra.mxu0 %v398_v1  ;;  %v391_v12 = vld [vmem:[%s543_s0] sm:$0xff]  ;;  %v415_v17 = vld [vmem:[%s545_s5 + $0x38] sm:$0xff]  ;;  %v414_v18 = vld [vmem:[%s545_s5 + $0x30] sm:$0xff] }
   0x7   :  { %189 = vmatpush.bf16.msra.mxu1 %v406_v3  ;;  %v400_v16 = vld [vmem:[%s541_s3] sm:$0xff]  ;;  %271 = vmatpush.bf16.msra.mxu2 %v415_v17  ;;  %v413_v19 = vld [vmem:[%s545_s5 + $0x28] sm:$0xff]  ;;  %v411_v21 = vld [vmem:[%s545_s5 + $0x18] sm:$0xff] }
   0x8   :  { %v412_v20 = vld [vmem:[%s545_s5 + $0x20] sm:$0xff]  ;;  %v410_v30 = vld [vmem:[%s545_s5 + $0x10] sm:$0xff]  ;;  %v409_v31 = vld [vmem:[%s545_s5 + $0x8] sm:$0xff] }
   0x9   :  { %v416_v23 = vld [vmem:[%s542_s2] ss:$0 sm:$0xff] }
   0xa   :  { %105 = vmatpush.bf16.msra.mxu0 %v397_v4  ;;  %v408_v32 = vld [vmem:[%s545_s5] sm:$0xff] }
   0xb   :  { %190 = vmatpush.bf16.msra.mxu1 %v405_v5  ;;  %272 = vmatpush.bf16.msra.mxu2 %v414_v18  ;;  %v417_v34 = vld [vmem:[%s544_s4] ss:$0 sm:$0xff] }
   0xe   :  { %106 = vmatpush.bf16.msra.mxu0 %v396_v6 }
   0xf   :  { %191 = vmatpush.bf16.msra.mxu1 %v404_v7  ;;  %273 = vmatpush.bf16.msra.mxu2 %v413_v19 }
  0x12   :  { %107 = vmatpush.bf16.msra.mxu0 %v395_v8 }
  0x13   :  { %192 = vmatpush.bf16.msra.mxu1 %v403_v13  ;;  %274 = vmatpush.bf16.msra.mxu2 %v412_v20 }
  0x16   :  { %108 = vmatpush.bf16.msra.mxu0 %v394_v9 }
  0x17   :  { %193 = vmatpush.bf16.msra.mxu1 %v402_v14  ;;  %275 = vmatpush.bf16.msra.mxu2 %v411_v21 }
  0x1a   :  { %109 = vmatpush.bf16.msra.mxu0 %v393_v10 }
  0x1b   :  { %194 = vmatpush.bf16.msra.mxu1 %v401_v15  ;;  %276 = vmatpush.bf16.msra.mxu2 %v410_v30 }
  0x1e   :  { %110 = vmatpush.bf16.msra.mxu0 %v392_v11 }
  0x1f   :  { %195 = vmatpush.bf16.msra.mxu1 %v400_v16  ;;  %277 = vmatpush.bf16.msra.mxu2 %v409_v31 }
  0x21   :  { %111 = vmatmul.bf16.vlgmr.msra.gmra.mxu0 %v391_v12 }
  0x23   :  { %278 = vmatpush.bf16.msra.mxu2 %v408_v32 }
  0x9e   :  { %v112_v22 = vpop.f32.mrf.mxu0 }
  0x9f   :  { %v113_v24 = vadd.f32 %v416_v23, %v112_v22 }
  0xa1   :  { %v117_v27 = vmax.f32 %v113_v24, 0.0 }
  0xa6   :  { %v114_v25 = vpop.f32.mrf.mxu0 }
  0xa7   :  { %v115_v26 = vadd.f32 %v416_v23, %v114_v25 }
  0xa9   :  { %v118_v28 = vmax.f32 %v115_v26, 0.0 }
  0xab   :  { %v119_v29 = vpack.c.bf16 %v118_v28, %v117_v27 }
  0xad   :  { %196 = vmatmul.bf16.vlgmr.msra.gmra.mxu1 %v119_v29 }
 0x12a   :  { %v197_v33 = vpop.f32.mrf.mxu1 }
 0x12b   :  { %v198_v36 = vadd.f32 %v417_v34, %v197_v33 }
 0x132   :  { %v199_v35 = vpop.f32.mrf.mxu1 }
 0x133   :  { %v200_v37 = vadd.f32 %v417_v34, %v199_v35 }
 0x135   :  { %v206_v38 = vpack.c.bf16 %v200_v37, %v198_v36 }
 0x137   :  { %279 = vmatmul.bf16.vlgmr.msra.gmra.mxu2 %v206_v38 }
 0x1ba   :  { %v280_v39 = vpop.f32.mrf.mxu2 }
 0x1bb   :  { %285 = vst [vmem:[%s546_s6] sm:$0xff] %v280_v39 }
 0x1c2   :  { %v282_v40 = vpop.f32.mrf.mxu2 }
 0x1c3   :  { %286 = vst [vmem:[%s546_s6 + $0x8] sm:$0xff] %v282_v40 }

</bundles_post_ra>
